<compile_context>
chip_gen: v7x
topology: tpu7x:2x2x1
jax: 0.10.0
libtpu: 0.0.40
codegen_flags: <defaults>
</compile_context>

<pallas_src>
import jax
import jax.numpy as jnp
from jax import lax
from jax.experimental import pallas as pl
from jax.experimental.pallas import tpu as pltpu


# ----------------------------- Pallas kernels ------------------------------ #

def proj_kernel(x_ref, w_ref, o_ref):
    # x_ref: [tm, Fin]   row tile of features
    # w_ref: [Fin, Fout] full weight
    # o_ref: [tm, Fout]
    o_ref[...] = jnp.dot(
        x_ref[...], w_ref[...], preferred_element_type=jnp.float32
    ).astype(o_ref.dtype)


def agg_kernel(a_ref, h_ref, b_ref, o_ref, acc_ref):
    # a_ref : [tm, tk]   tile of the norm-folded adjacency A_hat
    # h_ref : [tk, Fout] tile of projected features H = X @ W
    # b_ref : [1, Fout]  bias (added in finalize only)
    # o_ref : [tm, Fout]
    # acc_ref: [tm, Fout] f32 accumulator scratch
    k = pl.program_id(1)

    @pl.when(k == 0)
    def _():
        acc_ref[...] = jnp.zeros_like(acc_ref)

    acc_ref[...] += jnp.dot(
        a_ref[...], h_ref[...], preferred_element_type=jnp.float32
    )

    @pl.when(k == pl.num_programs(1) - 1)
    def _():
        o_ref[...] = (acc_ref[...] + b_ref[...]).astype(o_ref.dtype)


def inner_product_kernel(zr_ref, zc_ref, o_ref):
    # zr_ref: [tm, H] row tile of z; zc_ref: [tn, H] column tile of z
    # contraction on the last dim of both operands -> no transpose materialized
    o_ref[...] = lax.dot_general(
        zr_ref[...], zc_ref[...],
        dimension_numbers=(((1,), (1,)), ((), ())),
        preferred_element_type=jnp.float32,
    ).astype(o_ref.dtype)


# ------------------------------- wrappers ---------------------------------- #

def _round_up(n, m):
    return ((n + m - 1) // m) * m


def _pad2d(a, rows, cols):
    r, c = a.shape
    return jnp.pad(a, ((0, rows - r), (0, cols - c)))


def project(x, w, *, tm=128, out_dtype=jnp.float32):
    """H = X @ W, tiled over rows of X. Fin/Fout are held fully in VMEM
    (fine for the modest feature widths of this model)."""
    Np, Fin = x.shape
    Fout = w.shape[1]
    assert Np % tm == 0 and Fin % 128 == 0 and Fout % 128 == 0
    return pl.pallas_call(
        proj_kernel,
        out_shape=jax.ShapeDtypeStruct((Np, Fout), out_dtype),
        grid_spec=pltpu.PrefetchScalarGridSpec(
            num_scalar_prefetch=0,
            grid=(Np // tm,),
            in_specs=[
                pl.BlockSpec((tm, Fin), lambda i: (i, 0)),
                pl.BlockSpec((Fin, Fout), lambda i: (0, 0)),
            ],
            out_specs=pl.BlockSpec((tm, Fout), lambda i: (i, 0)),
        ),
        compiler_params=pltpu.CompilerParams(dimension_semantics=("parallel",)),
    )(x, w)


def aggregate(a_hat, h, bias2d, *, tm=128, tk=128):
    """Z = A_hat @ H + b with a source-node (K) reduction axis + accumulator."""
    Np = a_hat.shape[0]
    Fout = h.shape[1]
    assert Np % tm == 0 and Np % tk == 0 and Fout % 128 == 0
    return pl.pallas_call(
        agg_kernel,
        out_shape=jax.ShapeDtypeStruct((Np, Fout), jnp.float32),
        grid_spec=pltpu.PrefetchScalarGridSpec(
            num_scalar_prefetch=0,
            grid=(Np // tm, Np // tk),
            in_specs=[
                pl.BlockSpec((tm, tk), lambda i, k: (i, k)),    # A_hat tile
                pl.BlockSpec((tk, Fout), lambda i, k: (k, 0)),  # H tile
                pl.BlockSpec((1, Fout), lambda i, k: (0, 0)),   # bias
            ],
            out_specs=pl.BlockSpec((tm, Fout), lambda i, k: (i, 0)),
            scratch_shapes=[pltpu.VMEM((tm, Fout), jnp.float32)],
        ),
        compiler_params=pltpu.CompilerParams(
            dimension_semantics=("parallel", "arbitrary")),
    )(a_hat, h, bias2d)


def inner_product_decoder(z, *, tm=128, tn=128):
    """adj_rec = z @ z.T, 2-D output tiling, no transpose inside the kernel."""
    Np, Hp = z.shape
    assert Np % tm == 0 and Np % tn == 0 and Hp % 128 == 0
    return pl.pallas_call(
        inner_product_kernel,
        out_shape=jax.ShapeDtypeStruct((Np, Np), jnp.float32),
        grid_spec=pltpu.PrefetchScalarGridSpec(
            num_scalar_prefetch=0,
            grid=(Np // tm, Np // tn),
            in_specs=[
                pl.BlockSpec((tm, Hp), lambda i, j: (i, 0)),
                pl.BlockSpec((tn, Hp), lambda i, j: (j, 0)),
            ],
            out_specs=pl.BlockSpec((tm, tn), lambda i, j: (i, j)),
        ),
        compiler_params=pltpu.CompilerParams(
            dimension_semantics=("parallel", "parallel")),
    )(z, z)


def gcnae_forward(adj, x, params, *, tile=128, lane=128, mm_dtype=jnp.float32):
    """adj: [N, N] weighted adjacency (dst, src); x: [N, in_feats].

    mm_dtype: dtype of the MXU operands for aggregation/decoder matmuls
    (jnp.bfloat16 recommended on v6e/v7x; accumulation is always f32).
    """
    N, Fin = x.shape
    H1 = params["w1"].shape[1]
    H2 = params["w2"].shape[1]

    # Degree norms (norm='both', clamp min 1, like dgl GraphConv).
    mask = (adj != 0.0).astype(jnp.float32)
    out_deg = jnp.maximum(jnp.sum(mask, axis=0), 1.0)   # per source node
    in_deg = jnp.maximum(jnp.sum(mask, axis=1), 1.0)    # per dest node
    norm_src = out_deg ** -0.5
    norm_dst = in_deg ** -0.5

    # Fold both norms into the adjacency once (paid once per forward, shared by
    # both layers) -> kernels are pure A_hat @ H + b MXU pipelines.
    a_hat = (norm_dst[:, None] * adj * norm_src[None, :]).astype(jnp.float32)

    # Zero-pad so every block dim is MXU/lane aligned (lane-dense stores).
    Np = _round_up(N, tile)
    Finp = _round_up(Fin, lane)
    H1p = _round_up(H1, lane)
    H2p = _round_up(H2, lane)

    a_hat_p = _pad2d(a_hat, Np, Np).astype(mm_dtype)
    x_p = _pad2d(x.astype(jnp.float32), Np, Finp)
    w1_p = _pad2d(params["w1"].astype(jnp.float32), Finp, H1p)
    b1_p = _pad2d(params["b1"].astype(jnp.float32), 1, H1p)
    w2_p = _pad2d(params["w2"].astype(jnp.float32), H1p, H2p)
    b2_p = _pad2d(params["b2"].astype(jnp.float32), 1, H2p)

    # TODO(synk): dropout is identity in inference mode.

    # layer1: z1 = A_hat @ (x @ W1) + b1  (projection hoisted, computed once)
    h1 = project(x_p, w1_p, tm=tile, out_dtype=mm_dtype)
    z1 = aggregate(a_hat_p, h1, b1_p, tm=tile, tk=tile)

    # layer2: z2 = A_hat @ (z1 @ W2) + b2
    h2 = project(z1, w2_p, tm=tile, out_dtype=mm_dtype)
    z2 = aggregate(a_hat_p, h2, b2_p, tm=tile, tk=tile)

    # decoder: adj_rec = z @ z.T (identity activation)
    adj_rec_p = inner_product_decoder(z2.astype(mm_dtype), tm=tile, tn=tile)

    return adj_rec_p[:N, :N], z2[:N, :H2]


def gcnae_reference(adj, x, params):
    """Pure-JAX reference for correctness checking."""
    mask = (adj != 0.0).astype(jnp.float32)
    norm_src = jnp.maximum(jnp.sum(mask, axis=0), 1.0) ** -0.5
    norm_dst = jnp.maximum(jnp.sum(mask, axis=1), 1.0) ** -0.5

    def layer(h, w, b):
        hs = (h * norm_src[:, None]) @ w
        out = adj @ hs
        return out * norm_dst[:, None] + b

    h = layer(x, params["w1"], params["b1"][0])
    h = layer(h, params["w2"], params["b2"][0])
    return h @ h.T, h


# --------------------------------- main ------------------------------------ #

if __name__ == "__main__":
    N = 256          # number of graph nodes
    IN_FEATS = 160
    N_HIDDEN = 64

    key = jax.random.PRNGKey(0)
    k_feat, k_mask, k_ew, k_w1, k_b1, k_w2, k_b2 = jax.random.split(key, 7)

    # deterministic node features
    x = jax.random.normal(k_feat, (N, IN_FEATS), dtype=jnp.float32)

    # deterministic sparse weighted graph (with self-loops so no 0-degree nodes)
    edge_mask = (jax.random.uniform(k_mask, (N, N)) < 0.1).astype(jnp.float32)
    edge_w = jax.random.uniform(k_ew, (N, N), minval=0.5, maxval=1.5)
    eye = jnp.eye(N, dtype=jnp.float32)
    adj = edge_mask * edge_w * (1.0 - eye) + eye          # [N_dst, N_src]

    # deterministic GraphConv parameters (glorot-ish scaling)
    params = {
        "w1": jax.random.normal(k_w1, (IN_FEATS, N_HIDDEN), jnp.float32)
        * (2.0 / (IN_FEATS + N_HIDDEN)) ** 0.5,
        "b1": jax.random.normal(k_b1, (1, N_HIDDEN), jnp.float32) * 0.01,
        "w2": jax.random.normal(k_w2, (N_HIDDEN, N_HIDDEN), jnp.float32)
        * (2.0 / (N_HIDDEN + N_HIDDEN)) ** 0.5,
        "b2": jax.random.normal(k_b2, (1, N_HIDDEN), jnp.float32) * 0.01,
    }

    adj_rec_ref, z_ref = gcnae_reference(adj, x, params)

    # f32 MXU-operand run (default; tight tolerances vs. reference).
    adj_rec, z = jax.block_until_ready(gcnae_forward(adj, x, params))
    assert adj_rec.shape == (N, N) and z.shape == (N, N_HIDDEN)
    assert jnp.allclose(z, z_ref, atol=1e-4, rtol=1e-4)
    assert jnp.allclose(adj_rec, adj_rec_ref, atol=1e-3, rtol=1e-3)

    # bf16 MXU-operand run (v6e/v7x fast path: half the adjacency DMA, 2x MXU
    # rate, f32 accumulation) -- validated with looser tolerances.
    adj_rec_bf, z_bf = jax.block_until_ready(
        gcnae_forward(adj, x, params, mm_dtype=jnp.bfloat16))
    assert jnp.allclose(z_bf, z_ref, atol=3e-2, rtol=5e-2)
    assert jnp.allclose(adj_rec_bf, adj_rec_ref, atol=3e-2, rtol=5e-2)

    print("KERNEL_OK")
</pallas_src>

<mosaic_0001>
module attributes {stable_mosaic.version = 11 : i64} {
  func.func @proj_kernel(%arg0: i32, %arg1: memref<128x256xf32, #tpu.memory_space<vmem>>, %arg2: memref<256x128xf32, #tpu.memory_space<vmem>>, %arg3: memref<128x128xf32, #tpu.memory_space<vmem>>) attributes {dimension_semantics = [#tpu.dimension_semantics<parallel>], iteration_bounds = array<i64: 2>, scalar_prefetch = 0 : i64, scratch_operands = 0 : i64, tpu.core_type = #tpu.core_type<tc>, window_params = [{transform_indices = @transform_0, window_bounds = array<i64: 128, 256>}, {pipeline_mode = #tpu.pipeline_mode<synchronous>, transform_indices = @transform_1, window_bounds = array<i64: 256, 128>}, {transform_indices = @transform_2, window_bounds = array<i64: 128, 128>}]} {
    %c0 = arith.constant 0 : index
    %c0_0 = arith.constant 0 : index
    %0 = vector.load %arg1[%c0, %c0_0] : memref<128x256xf32, #tpu.memory_space<vmem>>, vector<128x256xf32>
    %c0_1 = arith.constant 0 : index
    %c0_2 = arith.constant 0 : index
    %1 = vector.load %arg2[%c0_1, %c0_2] : memref<256x128xf32, #tpu.memory_space<vmem>>, vector<256x128xf32>
    %cst = arith.constant dense<0.000000e+00> : vector<128x128xf32>
    %2 = tpu.matmul %0, %1, %cst {dimension_numbers = #tpu.dot_dimension_numbers<[1], [0], [0], [1], [0, 0, 1, 1], [], []>} : vector<128x256xf32>, vector<256x128xf32>, vector<128x128xf32> -> vector<128x128xf32>
    %c0_3 = arith.constant 0 : index
    %c0_4 = arith.constant 0 : index
    %3 = vector.load %arg3[%c0_3, %c0_4] : memref<128x128xf32, #tpu.memory_space<vmem>>, vector<128x128xf32>
    tpu.vector_store %arg3[%c0_3, %c0_4], %2 {strides = array<i32>} : memref<128x128xf32, #tpu.memory_space<vmem>>, vector<128x128xf32>,
    return
  }
  func.func @transform_0(%arg0: i32) -> (i32, i32) {
    %c0_i32 = arith.constant 0 : i32
    %c0_i32_0 = arith.constant 0 : i32
    return %arg0, %c0_i32 : i32, i32
  }
  func.func @transform_1(%arg0: i32) -> (i32, i32) {
    %c0_i32 = arith.constant 0 : i32
    %c0_i32_0 = arith.constant 0 : i32
    %c0_i32_1 = arith.constant 0 : i32
    return %c0_i32, %c0_i32_0 : i32, i32
  }
  func.func @transform_2(%arg0: i32) -> (i32, i32) {
    %c0_i32 = arith.constant 0 : i32
    %c0_i32_0 = arith.constant 0 : i32
    return %arg0, %c0_i32 : i32, i32
  }
}

</mosaic_0001>

<bundles_post_ra>
// kernel: tpu_custom_call.1
= control target key start
LH: loop header
LB: loop body
LE: loop exit
PB: predicated region body
PF: predicated region fallthrough
CT: control target
= control target key end

     0   :  { %7 = vsyncpa [#allocation3], 0  ;;  %s1122_s0 = inlined_call_operand.hbm [shape: f32[256,256], index: 0, kind: input, shape index: {}]   ;;  %s1123_s1 = inlined_call_operand.hbm [shape: f32[256,128], index: 1, kind: input, shape index: {}]   ;;  %s1124_s2 = inlined_call_operand.hbm [shape: f32[256,128], index: 2, kind: output, shape index: {}]  }
   0x1   :  { %9 = vsyncpa [#allocation3 + $0x1], 0 }
   0x2   :  { %10 = vsyncpa [#allocation6], 0 }
   0x3   :  { %11 = vsyncpa [#allocation4], 0 }
   0x4   :  { %13 = vsyncpa [#allocation4 + $0x1], 0  ;;  %s867_s9 = smov 0   ;;  %s869_s10 = smov 0  }
   0x5   :  { %s871_s11 = smov 0   ;;  %s873_s12 = smov 0  }
   0x6 LB: > { %s888_s13 = sadd.s32 4294967295, %s841_s12   ;;  %s502_s14 = sadd.s32 4294967294, %s841_s12   ;;  %s841_s12 = sphi %s873_s12, %s1144_s12   ;;  %s837_s11 = sphi %s871_s11, %s1143_s11   ;;  %s833_s10 = sphi %s869_s10, %s1142_s10   ;;  %s829_s9 = sphi %s867_s9, %s1141_s9  }
   0x7   : > { %p39_p0 = scmp.ne.s32.totalorder %s833_s10, %s829_s9  ;;  %p1125_p1 = scmp.eq.s32.totalorder %s888_s13, 0 }
   0x8   : > { %p90_p3 = scmp.eq.s32.totalorder %s502_s14, 1  ;;  %p503_p5 = scmp.ge.s32.totalorder %s841_s12, 1 }
   0x9   : > { %p897_p4 = por %p1125_p1, %p39_p0  ;;  %p97_p7 = scmp.lt.s32.totalorder %s841_s12, 3 }
   0xa   : > { %p902_p6 = por %p90_p3, %p39_p0  ;;  %s843_s18 = smov [#allocation5]  }
   0xb   : > { %s1128_s15 = scalar_select %p897_p4, 1, 0 }
   0xc   : > { %s1129_s16 = scalar_select %p902_p6, 1, 0 }
   0xd   : > { %p907_p8 = pnand %p503_p5, %p97_p7  ;;  %s109_s19 = sshll.u32 %s843_s18, 4  ;;  %s911_s19 = int_to_ptr.vmem [resolvable:$true] %s109_s19 }
   0xe   : > { %s923_s21 = sadd.s32 1, %s841_s12   ;;  %s26_s22 = sadd.s32 1, %s837_s11 }
   0xf   : > { %s1130_s17 = scalar_select %p907_p8, 1, 0 }
  0x10   : > { %p658_p9 = pneg %p907_p8  ;;  %s23_s23 = ssub.s32 %s841_s12, %s923_s21 }
  0x11   : > { %s713_s26 = scalar_lea.hbm %s1123_s1, 4096 }
  0x12   : > { %p918_p11 = pnand %p658_p9, %p1125_p1  ;;  %p714_p12 = scmp.ne.s32.totalorder %s1123_s1, %s713_s26 }
  0x13   : > { %p720_p5 = scmp.lt.u32.totalorder %s713_s26, %s1123_s1 }
  0x14   : > { %p715_p13 = pneg %p918_p11 }
  0x16   : > { %p716_p0 = pnand %p715_p13, %p714_p12 }
  0x18   : > { %p717_p3 = pneg %p716_p0 }
  0x1a   : > { %p722_p7 = pnand %p720_p5, %p717_p3 }
  0x1c   : > { %725 = shalt.err (!%p722_p7)
}
  0x1d   : > { %s726_s3 = scalar_lea.vmem %s911_s19, 4096  ;;  %p734_p2 = scmp.lt.s32.totalorder %s911_s19, %s911_s19 }
  0x1e   : > { %p727_p9 = scmp.ne.s32.totalorder %s911_s19, %s726_s3  ;;  %p735_p6 = scmp.lt.s32.totalorder %s726_s3, %s726_s3 }
  0x20   : > { %p729_p10 = pnand %p727_p9, %p715_p13  ;;  %p736_p4 = por %p735_p6, %p734_p2 }
  0x22   : > { %p730_p1 = pneg %p729_p10 }
  0x24   : > { %p737_p8 = pnand %p736_p4, %p730_p1 }
  0x26   : > { %740 = shalt.err (!%p737_p8)
}
  0x27   : > { %s844_s4 = smov 128   ;;  %s845_s5 = smov 8  }
  0x28   : > { %661 = dma.hbm_to_vmem [thread:$0]  (!%p918_p11), %s1123_s1, 4096, %s911_s19, [#allocation6], %s844_s4, %s844_s4, %s845_s5  }
  0x29   : > { %p24_p2 = scmp.eq.s32.totalorder %s23_s23, 0  ;;  %p33_p1 = scmp.ne.s32.totalorder %s837_s11, %s833_s10 }
  0x2a   : > { %p34_p4 = scmp.eq.s32.totalorder %s841_s12, 0  ;;  %p671_p6 = scmp.lt.s32.totalorder %s841_s12, 2 }
  0x2b   : > { %s954_s8 = scalar_select %p24_p2, %s837_s11, %s26_s22  }
  0x2c   : > { %p35_p8 = por %p34_p4, %p33_p1  ;;  %p1132_p10 = scmp.eq.s32.totalorder %s888_s13, 1 }
  0x2d   : > { %s123_s18 = sand.u32 1, %s837_s11   ;;  %s520_s24 = sshll.u32 %s841_s12, 12 }
  0x2e   : > { %p958_p12 = por %p1132_p10, %p33_p1  ;;  %s506_s25 = sshll.u32 %s123_s18, 8 }
  0x2f   : > { %s967_s27 = scalar_lea.hbm %s1122_s0, %s520_s24  ;;  %s127_s19 = scalar_lea.vmem [#allocation2], %s506_s25 }
  0x30   : > { %s135_s22 = sshll.u32 %s127_s19, 4  ;;  %p969_p11 = pnand %p671_p6, %p35_p8  ;;  %s973_s22 = int_to_ptr.vmem [resolvable:$true] %s135_s22 }
  0x31   : > { %s975_s28 = scalar_lea.sflag [#allocation3], %s123_s18  ;;  %s741_s29 = scalar_lea.hbm %s967_s27, 4096 }
  0x32   : > { %p742_p13 = scmp.ne.s32.totalorder %s967_s27, %s741_s29  ;;  %p743_p0 = pneg %p969_p11 }
  0x33   : > { %s746_s4 = scalar_lea.hbm %s1122_s0, 8192  ;;  %p747_p7 = scmp.lt.u32.totalorder %s967_s27, %s1122_s0 }
  0x34   : > { %p744_p3 = pnand %p743_p0, %p742_p13  ;;  %p748_p9 = scmp.lt.u32.totalorder %s746_s4, %s741_s29 }
  0x35   : > { %p750_p1 = scmp.lt.u32.totalorder %s741_s29, %s967_s27 }
  0x36   : > { %p745_p5 = pneg %p744_p3  ;;  %p749_p2 = por %p748_p9, %p747_p7 }
  0x38   : > { %p751_p4 = por %p750_p1, %p749_p2 }
  0x3a   : > { %p752_p6 = pnand %p751_p4, %p745_p5 }
  0x3c   : > { %755 = shalt.err (!%p752_p6)
}
  0x3d   : > { %s756_s7 = scalar_lea.vmem %s973_s22, 4096  ;;  %s846_s18 = smov [#allocation2]  }
  0x3e   : > { %p757_p8 = scmp.ne.s32.totalorder %s973_s22, %s756_s7  ;;  %s761_s24 = sshll.u32 %s846_s18, 4  ;;  %s762_s24 = int_to_ptr.vmem [resolvable:$false] %s761_s24 }
  0x3f   : > { %s763_s25 = scalar_lea.vmem %s762_s24, 8192  ;;  %p764_p3 = scmp.lt.s32.totalorder %s973_s22, %s762_s24 }
  0x40   : > { %p759_p10 = pnand %p757_p8, %p743_p0  ;;  %p765_p7 = scmp.lt.s32.totalorder %s763_s25, %s756_s7 }
  0x42   : > { %p760_p13 = pneg %p759_p10  ;;  %p766_p9 = por %p765_p7, %p764_p3 }
  0x44   : > { %p767_p2 = pnand %p766_p9, %p760_p13 }
  0x46   : > { %770 = shalt.err (!%p767_p2)
}
  0x47   : > { %s847_s20 = smov 256   ;;  %s848_s26 = smov 16  }
  0x48   : > { %665 = dma.hbm_to_vmem [thread:$0]  (!%p969_p11), %s967_s27, 4096, %s973_s22, %s975_s28, %s847_s20, %s847_s20, %s848_s26  }
  0x49   : > { %p1135_p0 = scmp.ne.s32.totalorder %s1130_s17, 0 }
  0x4a   : > { %s1006_s19 = sand.u32 (!%p1135_p0), 1, %s833_s10   ;;  %p1136_p5 = scmp.ne.s32.totalorder (!%p1135_p0), %s1128_s15, 0 }
  0x4b   : > { %147 = sbr.rel (%p1135_p0) target bundleno = 379 (0x17b), region = 28  ;;  %s511_s29 = sshll.u32 (!%p1135_p0), %s1006_s19, 8 }
  0x4c   : > { %s150_s30 = scalar_lea.sflag (!%p1135_p0), [#allocation3], %s1006_s19  ;;  %s1010_s3 = scalar_lea.vmem (!%p1135_p0), [#allocation2], %s511_s29 }
  0x52   : > { %816 = dma.done.wait (%p1136_p5), %s150_s30, 4096  }
  0x53   : > { %818 = vsyncadd (%p1136_p5), %s150_s30, 4294963200  ;;  %p1137_p11 = scmp.eq.s32.totalorder %s888_s13, 0 }
  0x55   : > { %820 = dma.done.wait (%p1137_p11), [#allocation6], 4096   ;;  %p1138_p1 = pmov %p1137_p11 }
  0x56   : > { %v228_v0 = vld [vmem:[#allocation5 + $0x80] sm:$0xff]  ;;  %v229_v1 = vld [vmem:[#allocation5 + $0x88] sm:$0xff]  ;;  %v230_v5 = vld [vmem:[#allocation5 + $0x90] sm:$0xff]  ;;  %s513_s15 = sshll.u32 %s1006_s19, 7  ;;  %s521_s27 = sshll.u32 %s888_s13, 11 }
  0x57   : > { %822 = vsyncadd (%p1138_p1), [#allocation6], 4294963200  ;;  %v212_v2 = vld [vmem:[#allocation5] sm:$0xff]  ;;  %v602_v3 = vpack.c.bf16 %v229_v1, %v228_v0  ;;  %v213_v4 = vld [vmem:[#allocation5 + $0x8] sm:$0xff]  ;;  %s1053_s17 = scalar_lea.vmem [#allocation7], %s513_s15  ;;  %s1074_s4 = scalar_lea.hbm %s1124_s2, %s521_s27 }
  0x58   : > { %v231_v6 = vld [vmem:[#allocation5 + $0x98] sm:$0xff]  ;;  %v604_v7 = vpack.c.bf16 %v213_v4, %v212_v2  ;;  %v214_v9 = vld [vmem:[#allocation5 + $0x10] sm:$0xff]  ;;  %v232_v11 = vld [vmem:[#allocation5 + $0xa0] sm:$0xff]  ;;  %s419_s22 = sshll.u32 %s1053_s17, 4  ;;  %s406_s13 = scalar_lea.sflag [#allocation4], %s1006_s19  ;;  %s1076_s22 = int_to_ptr.vmem [resolvable:$true] %s419_s22 }
  0x59   : > { %v606_v8 = vpack.c.bf16 %v231_v6, %v230_v5  ;;  %v215_v10 = vld [vmem:[#allocation5 + $0x18] sm:$0xff]  ;;  %603 = vmatprep.subr.bf16.mxu0 %v602_v3  ;;  %634 = vmatprep.subr.bf16.mxu1 %v602_v3  ;;  %v233_v12 = vld [vmem:[#allocation5 + $0xa8] sm:$0xff]  ;;  %v216_v15 = vld [vmem:[#allocation5 + $0x20] sm:$0xff]  ;;  %s771_s5 = scalar_lea.vmem %s1076_s22, 2048  ;;  %s849_s6 = smov [#allocation7]  }
  0x5a   : > { %605 = vmatpush3.bf16.msra.mxu0 %v604_v7  ;;  %642 = vmatpush3.bf16.msra.mxu1 %v604_v7  ;;  %v608_v13 = vpack.c.bf16 %v215_v10, %v214_v9  ;;  %v610_v14 = vpack.c.bf16 %v233_v12, %v232_v11  ;;  %v217_v16 = vld [vmem:[#allocation5 + $0x28] sm:$0xff]  ;;  %v234_v17 = vld [vmem:[#allocation5 + $0xb0] sm:$0xff]  ;;  %v235_v18 = vld [vmem:[#allocation5 + $0xb8] sm:$0xff]  ;;  %p772_p4 = scmp.ne.s32.totalorder %s1076_s22, %s771_s5  ;;  %s775_s7 = sshll.u32 %s849_s6, 4  ;;  %s776_s7 = int_to_ptr.vmem [resolvable:$false] %s775_s7 }
  0x5b   : > { %607 = vmatprep.subr.bf16.mxu0 %v606_v8  ;;  %635 = vmatprep.subr.bf16.mxu1 %v606_v8  ;;  %v612_v19 = vpack.c.bf16 %v217_v16, %v216_v15  ;;  %v614_v20 = vpack.c.bf16 %v235_v18, %v234_v17  ;;  %v218_v21 = vld [vmem:[#allocation5 + $0x30] sm:$0xff]  ;;  %v219_v22 = vld [vmem:[#allocation5 + $0x38] sm:$0xff]  ;;  %v236_v23 = vld [vmem:[#allocation5 + $0xc0] sm:$0xff]  ;;  %s777_s18 = scalar_lea.vmem %s776_s7, 4096  ;;  %p778_p10 = scmp.lt.s32.totalorder %s1076_s22, %s776_s7 }
  0x5c   : > { %v237_v24 = vld [vmem:[#allocation5 + $0xc8] sm:$0xff]  ;;  %v616_v27 = vpack.c.bf16 %v219_v22, %v218_v21  ;;  %v220_v29 = vld [vmem:[#allocation5 + $0x40] sm:$0xff]  ;;  %v238_v31 = vld [vmem:[#allocation5 + $0xd0] sm:$0xff]  ;;  %p773_p6 = pnand %p772_p4, %p958_p12  ;;  %p779_p13 = scmp.lt.s32.totalorder %s777_s18, %s771_s5 }
  0x5d   : > { %v181_v25 = vld [vmem:[%s1010_s3 + $0x8] sm:$0xff]  ;;  %v618_v28 = vpack.c.bf16 %v237_v24, %v236_v23  ;;  %v239_v32 = vld [vmem:[#allocation5 + $0xd8] sm:$0xff]  ;;  %v222_v35 = vld [vmem:[#allocation5 + $0x50] sm:$0xff] }
  0x5e   : > { %609 = vmatpush3.bf16.msra.mxu0 %v608_v13  ;;  %643 = vmatpush3.bf16.msra.mxu1 %v608_v13  ;;  %v197_v26 = vld [vmem:[%s1010_s3 + $0x88] sm:$0xff]  ;;  %v622_v34 = vpack.c.bf16 %v239_v32, %v238_v31  ;;  %v223_v36 = vld [vmem:[#allocation5 + $0x58] sm:$0xff]  ;;  %v240_v37 = vld [vmem:[#allocation5 + $0xe0] sm:$0xff]  ;;  %p774_p8 = pneg %p773_p6  ;;  %p780_p3 = por %p779_p13, %p778_p10 }
  0x5f   : > { %611 = vmatprep.subr.bf16.mxu0 %v610_v14  ;;  %636 = vmatprep.subr.bf16.mxu1 %v610_v14  ;;  %v221_v30 = vld [vmem:[#allocation5 + $0x48] sm:$0xff]  ;;  %v624_v39 = vpack.c.bf16 %v223_v36, %v222_v35  ;;  %v224_v41 = vld [vmem:[#allocation5 + $0x60] sm:$0xff]  ;;  %v242_v43 = vld [vmem:[#allocation5 + $0xf0] sm:$0xff] }
  0x60   : > { %308 = vmatprep.mubr.f32.mxu0 %v181_v25  ;;  %348 = vmatprep.mubr.f32.mxu1 %v197_v26  ;;  %v620_v33 = vpack.c.bf16 %v221_v30, %v220_v29  ;;  %v241_v38 = vld [vmem:[#allocation5 + $0xe8] sm:$0xff]  ;;  %v243_v44 = vld [vmem:[#allocation5 + $0xf8] sm:$0xff]  ;;  %v226_v47 = vld [vmem:[#allocation5 + $0x70] sm:$0xff]  ;;  %p781_p7 = pnand %p780_p3, %p774_p8 }
  0x61   : > { %v626_v40 = vpack.c.bf16 %v241_v38, %v240_v37  ;;  %v225_v42 = vld [vmem:[#allocation5 + $0x68] sm:$0xff]  ;;  %v630_v46 = vpack.c.bf16 %v243_v44, %v242_v43  ;;  %v227_v48 = vld [vmem:[#allocation5 + $0x78] sm:$0xff]  ;;  %v180_v50 = vld [vmem:[%s1010_s3] sm:$0xff] }
  0x62   : > { %613 = vmatpush3.bf16.msra.mxu0 %v612_v19  ;;  %644 = vmatpush3.bf16.msra.mxu1 %v612_v19  ;;  %v628_v45 = vpack.c.bf16 %v225_v42, %v224_v41  ;;  %v632_v49 = vpack.c.bf16 %v227_v48, %v226_v47  ;;  %v196_v51 = vld [vmem:[%s1010_s3 + $0x80] sm:$0xff]  ;;  %v183_v52 = vld [vmem:[%s1010_s3 + $0x18] sm:$0xff]  ;;  %v182_v54 = vld [vmem:[%s1010_s3 + $0x10] sm:$0xff] }
  0x63   : > { %615 = vmatprep.subr.bf16.mxu0 %v614_v20  ;;  %637 = vmatprep.subr.bf16.mxu1 %v614_v20  ;;  %v199_v53 = vld [vmem:[%s1010_s3 + $0x98] sm:$0xff]  ;;  %v198_v55 = vld [vmem:[%s1010_s3 + $0x90] sm:$0xff]  ;;  %v185_v56 = vld [vmem:[%s1010_s3 + $0x28] sm:$0xff] }
  0x64   : > { %v201_v57 = vld [vmem:[%s1010_s3 + $0xa8] sm:$0xff]  ;;  %v184_v58 = vld [vmem:[%s1010_s3 + $0x20] sm:$0xff]  ;;  %v187_v60 = vld [vmem:[%s1010_s3 + $0x38] sm:$0xff] }
  0x65   : > { %v200_v59 = vld [vmem:[%s1010_s3 + $0xa0] sm:$0xff]  ;;  %v203_v61 = vld [vmem:[%s1010_s3 + $0xb8] sm:$0xff]  ;;  %v186_v62 = vld [vmem:[%s1010_s3 + $0x30] sm:$0xff] }
  0x66   : > { %617 = vmatpush3.bf16.msra.mxu0 %v616_v27  ;;  %645 = vmatpush3.bf16.msra.mxu1 %v616_v27  ;;  %v202_v63 = vld [vmem:[%s1010_s3 + $0xb0] sm:$0xff]  ;;  %v189_v0 = vld [vmem:[%s1010_s3 + $0x48] sm:$0xff]  ;;  %v188_v2 = vld [vmem:[%s1010_s3 + $0x40] sm:$0xff] }
  0x67   : > { %619 = vmatprep.subr.bf16.mxu0 %v618_v28  ;;  %638 = vmatprep.subr.bf16.mxu1 %v618_v28  ;;  %v205_v1 = vld [vmem:[%s1010_s3 + $0xc8] sm:$0xff]  ;;  %v204_v3 = vld [vmem:[%s1010_s3 + $0xc0] sm:$0xff]  ;;  %v191_v4 = vld [vmem:[%s1010_s3 + $0x58] sm:$0xff] }
  0x68   : > { %v207_v5 = vld [vmem:[%s1010_s3 + $0xd8] sm:$0xff]  ;;  %v190_v6 = vld [vmem:[%s1010_s3 + $0x50] sm:$0xff]  ;;  %v193_v8 = vld [vmem:[%s1010_s3 + $0x68] sm:$0xff] }
  0x69   : > { %v206_v7 = vld [vmem:[%s1010_s3 + $0xd0] sm:$0xff]  ;;  %v209_v9 = vld [vmem:[%s1010_s3 + $0xe8] sm:$0xff]  ;;  %v192_v10 = vld [vmem:[%s1010_s3 + $0x60] sm:$0xff] }
  0x6a   : > { %621 = vmatpush3.bf16.msra.mxu0 %v620_v33  ;;  %646 = vmatpush3.bf16.msra.mxu1 %v620_v33  ;;  %v208_v11 = vld [vmem:[%s1010_s3 + $0xe0] sm:$0xff]  ;;  %v195_v12 = vld [vmem:[%s1010_s3 + $0x78] sm:$0xff]  ;;  %v194_v14 = vld [vmem:[%s1010_s3 + $0x70] sm:$0xff] }
  0x6b   : > { %623 = vmatprep.subr.bf16.mxu0 %v622_v34  ;;  %639 = vmatprep.subr.bf16.mxu1 %v622_v34  ;;  %v211_v13 = vld [vmem:[%s1010_s3 + $0xf8] sm:$0xff]  ;;  %v210_v15 = vld [vmem:[%s1010_s3 + $0xf0] sm:$0xff] }
  0x6e   : > { %625 = vmatpush3.bf16.msra.mxu0 %v624_v39  ;;  %647 = vmatpush3.bf16.msra.mxu1 %v624_v39 }
  0x6f   : > { %627 = vmatprep.subr.bf16.mxu0 %v626_v40  ;;  %640 = vmatprep.subr.bf16.mxu1 %v626_v40 }
  0x72   : > { %629 = vmatpush3.bf16.msra.mxu0 %v628_v45  ;;  %648 = vmatpush3.bf16.msra.mxu1 %v628_v45 }
  0x73   : > { %631 = vmatprep.subr.bf16.mxu0 %v630_v46  ;;  %641 = vmatprep.subr.bf16.mxu1 %v630_v46 }
  0x76   : > { %633 = vmatpush3.bf16.msra.mxu0 %v632_v49  ;;  %649 = vmatpush3.bf16.msra.mxu1 %v632_v49 }
  0x79   : > { %309 = vmatmul.mubr.f32.vlgmr.msra.gmra.mrb[0].mxu0 %v180_v50  ;;  %349 = vmatmul.mubr.f32.vlgmr.msra.gmra.mrb[0].mxu1 %v196_v51 }
  0x7a   : > { %313 = vmatprep.mubr.f32.mxu0 %v183_v52  ;;  %353 = vmatprep.mubr.f32.mxu1 %v199_v53 }
  0x7d   : > { %314 = vmatmul.mubr.f32.gmra.mrb[2].mxu0 %v182_v54  ;;  %354 = vmatmul.mubr.f32.gmra.mrb[2].mxu1 %v198_v55 }
  0x7e   : > { %318 = vmatprep.mubr.f32.mxu0 %v185_v56  ;;  %358 = vmatprep.mubr.f32.mxu1 %v201_v57 }
  0x81   : > { %319 = vmatmul.mubr.f32.gmra.mrb[4].mxu0 %v184_v58  ;;  %359 = vmatmul.mubr.f32.gmra.mrb[4].mxu1 %v200_v59 }
  0x82   : > { %323 = vmatprep.mubr.f32.mxu0 %v187_v60  ;;  %363 = vmatprep.mubr.f32.mxu1 %v203_v61 }
  0x85   : > { %324 = vmatmul.mubr.f32.gmra.mrb[6].mxu0 %v186_v62  ;;  %364 = vmatmul.mubr.f32.gmra.mrb[6].mxu1 %v202_v63 }
  0x86   : > { %328 = vmatprep.mubr.f32.mxu0 %v189_v0  ;;  %368 = vmatprep.mubr.f32.mxu1 %v205_v1 }
  0x89   : > { %329 = vmatmul.mubr.f32.gmra.mrb[8].mxu0 %v188_v2  ;;  %369 = vmatmul.mubr.f32.gmra.mrb[8].mxu1 %v204_v3 }
  0x8a   : > { %333 = vmatprep.mubr.f32.mxu0 %v191_v4  ;;  %373 = vmatprep.mubr.f32.mxu1 %v207_v5 }
  0x8d   : > { %334 = vmatmul.mubr.f32.gmra.mrb[10].mxu0 %v190_v6  ;;  %374 = vmatmul.mubr.f32.gmra.mrb[10].mxu1 %v206_v7 }
  0x8e   : > { %338 = vmatprep.mubr.f32.mxu0 %v193_v8  ;;  %378 = vmatprep.mubr.f32.mxu1 %v209_v9 }
  0x91   : > { %339 = vmatmul.mubr.f32.gmra.mrb[12].mxu0 %v192_v10  ;;  %379 = vmatmul.mubr.f32.gmra.mrb[12].mxu1 %v208_v11 }
  0x92   : > { %343 = vmatprep.mubr.f32.mxu0 %v195_v12  ;;  %383 = vmatprep.mubr.f32.mxu1 %v211_v13 }
  0x95   : > { %344 = vmatmul.mubr.f32.gmra.mrb[14].mxu0 %v194_v14  ;;  %384 = vmatmul.mubr.f32.gmra.mrb[14].mxu1 %v210_v15 }
 0x14c   : > { %v554_v16 = vpop.f32.mrb[0].mxu0  ;;  %v578_v17 = vpop.f32.mrb[0].mxu1 }
 0x14d   : > { %v555_v18 = vpop.f32.mrb[1].mxu0  ;;  %v579_v19 = vpop.f32.mrb[1].mxu1 }
 0x14e   : > { %v556_v20 = vadd.f32 %v555_v18, %v554_v16  ;;  %v580_v21 = vadd.f32 %v579_v19, %v578_v17 }
 0x150   : > { %389 = vst [vmem:[%s1053_s17] sm:$0xff] %v556_v20  ;;  %397 = vst [vmem:[%s1053_s17 + $0x40] sm:$0xff] %v580_v21  ;;  %v557_v22 = vpop.f32.mrb[2].mxu0  ;;  %v581_v23 = vpop.f32.mrb[2].mxu1 }
 0x151   : > { %v558_v24 = vpop.f32.mrb[3].mxu0  ;;  %v582_v25 = vpop.f32.mrb[3].mxu1 }
 0x152   : > { %v559_v26 = vadd.f32 %v558_v24, %v557_v22  ;;  %v583_v27 = vadd.f32 %v582_v25, %v581_v23 }
 0x154   : > { %390 = vst [vmem:[%s1053_s17 + $0x8] sm:$0xff] %v559_v26  ;;  %398 = vst [vmem:[%s1053_s17 + $0x48] sm:$0xff] %v583_v27  ;;  %v560_v28 = vpop.f32.mrb[4].mxu0  ;;  %v584_v29 = vpop.f32.mrb[4].mxu1 }
 0x155   : > { %v561_v30 = vpop.f32.mrb[5].mxu0  ;;  %v585_v31 = vpop.f32.mrb[5].mxu1 }
 0x156   : > { %v562_v32 = vadd.f32 %v561_v30, %v560_v28  ;;  %v586_v33 = vadd.f32 %v585_v31, %v584_v29 }
 0x158   : > { %391 = vst [vmem:[%s1053_s17 + $0x10] sm:$0xff] %v562_v32  ;;  %399 = vst [vmem:[%s1053_s17 + $0x50] sm:$0xff] %v586_v33  ;;  %v563_v34 = vpop.f32.mrb[6].mxu0  ;;  %v587_v35 = vpop.f32.mrb[6].mxu1 }
 0x159   : > { %v564_v36 = vpop.f32.mrb[7].mxu0  ;;  %v588_v37 = vpop.f32.mrb[7].mxu1 }
 0x15a   : > { %v565_v38 = vadd.f32 %v564_v36, %v563_v34  ;;  %v589_v39 = vadd.f32 %v588_v37, %v587_v35 }
 0x15c   : > { %392 = vst [vmem:[%s1053_s17 + $0x18] sm:$0xff] %v565_v38  ;;  %400 = vst [vmem:[%s1053_s17 + $0x58] sm:$0xff] %v589_v39  ;;  %v566_v40 = vpop.f32.mrb[8].mxu0  ;;  %v590_v41 = vpop.f32.mrb[8].mxu1 }
 0x15d   : > { %v567_v42 = vpop.f32.mrb[9].mxu0  ;;  %v591_v43 = vpop.f32.mrb[9].mxu1 }
 0x15e   : > { %v568_v44 = vadd.f32 %v567_v42, %v566_v40  ;;  %v592_v45 = vadd.f32 %v591_v43, %v590_v41 }
 0x160   : > { %393 = vst [vmem:[%s1053_s17 + $0x20] sm:$0xff] %v568_v44  ;;  %401 = vst [vmem:[%s1053_s17 + $0x60] sm:$0xff] %v592_v45  ;;  %v569_v46 = vpop.f32.mrb[10].mxu0  ;;  %v593_v47 = vpop.f32.mrb[10].mxu1 }
 0x161   : > { %v570_v48 = vpop.f32.mrb[11].mxu0  ;;  %v594_v49 = vpop.f32.mrb[11].mxu1 }
 0x162   : > { %v571_v50 = vadd.f32 %v570_v48, %v569_v46  ;;  %v595_v51 = vadd.f32 %v594_v49, %v593_v47 }
 0x164   : > { %394 = vst [vmem:[%s1053_s17 + $0x28] sm:$0xff] %v571_v50  ;;  %402 = vst [vmem:[%s1053_s17 + $0x68] sm:$0xff] %v595_v51  ;;  %v572_v52 = vpop.f32.mrb[12].mxu0  ;;  %v596_v53 = vpop.f32.mrb[12].mxu1 }
 0x165   : > { %v573_v54 = vpop.f32.mrb[13].mxu0  ;;  %v597_v55 = vpop.f32.mrb[13].mxu1 }
 0x166   : > { %v574_v56 = vadd.f32 %v573_v54, %v572_v52  ;;  %v598_v57 = vadd.f32 %v597_v55, %v596_v53 }
 0x168   : > { %395 = vst [vmem:[%s1053_s17 + $0x30] sm:$0xff] %v574_v56  ;;  %403 = vst [vmem:[%s1053_s17 + $0x70] sm:$0xff] %v598_v57  ;;  %v575_v58 = vpop.f32.mrb[14].mxu0  ;;  %v599_v59 = vpop.f32.mrb[14].mxu1 }
 0x169   : > { %v576_v60 = vpop.f32.mrb[15].mxu0  ;;  %v600_v61 = vpop.f32.mrb[15].mxu1 }
 0x16a   : > { %v577_v62 = vadd.f32 %v576_v60, %v575_v58  ;;  %v601_v63 = vadd.f32 %v600_v61, %v599_v59 }
 0x16c   : > { %396 = vst [vmem:[%s1053_s17 + $0x38] sm:$0xff] %v577_v62  ;;  %404 = vst [vmem:[%s1053_s17 + $0x78] sm:$0xff] %v601_v63 }
 0x16d   : > { %784 = shalt.err (!%p781_p7)
}
 0x16e   : > { %s785_s24 = scalar_lea.hbm %s1074_s4, 2048  ;;  %s789_s26 = scalar_lea.hbm %s1124_s2, 4096 }
 0x16f   : > { %p786_p9 = scmp.ne.s32.totalorder %s1074_s4, %s785_s24  ;;  %p790_p5 = scmp.lt.u32.totalorder %s1074_s4, %s1124_s2 }
 0x170   : > { %p791_p11 = scmp.lt.u32.totalorder %s789_s26, %s785_s24  ;;  %p793_p4 = scmp.lt.u32.totalorder %s785_s24, %s1074_s4 }
 0x171   : > { %p787_p2 = pnand %p786_p9, %p958_p12 }
 0x172   : > { %p792_p1 = por %p791_p11, %p790_p5 }
 0x173   : > { %p788_p0 = pneg %p787_p2 }
 0x174   : > { %p794_p6 = por %p793_p4, %p792_p1 }
 0x176   : > { %p795_p8 = pnand %p794_p6, %p788_p0 }
 0x178   : > { %798 = shalt.err (!%p795_p8)
}
 0x179   : > { %s850_s3 = smov 128   ;;  %s851_s15 = smov 8  }
 0x17a   : > { %656 = dma.vmem_to_hbm [thread:$0]  (%p958_p12), %s1076_s22, 2048, %s1074_s4, %s406_s13, %s850_s3, %s850_s3, %s851_s15  }
 0x17b PF: > { %s434_s17 = sand.u32 1, %s829_s9   ;;  %p1139_p10 = scmp.ne.s32.totalorder %s1129_s16, 0 }
 0x17c   : > { %p1140_p13 = scmp.ge.s32.totalorder %s841_s12, 2  ;;  %s435_s27 = scalar_lea.sflag [#allocation4], %s434_s17 }
 0x17e   : > { %p667_p3 = pnand %p1140_p13, %p1139_p10 }
 0x180   : > { %824 = dma.done.wait (!%p667_p3), %s435_s27, 2048  }
 0x181   : > { %826 = vsyncadd (!%p667_p3), %s435_s27, 4294965248  ;;  %p16_p7 = scmp.ge.s32.totalorder %s923_s21, 4   ;;  %s1141_s9 = smov %s833_s10 }
 0x182   : > { %s1142_s10 = smov %s837_s11  ;;  %s1143_s11 = smov %s954_s8 }
 0x183   : > { %s1144_s12 = smov %s923_s21  ;;  %18 = sbr.rel (!%p16_p7) target bundleno = 6 (0x6), region = 77 }
 0x18a   :  { %440 = vsyncpa [#allocation3], 1 }
 0x18b   :  { %442 = vsyncpa [#allocation3 + $0x1], 1 }
 0x18c   :  { %443 = vsyncpa [#allocation6], 1 }
 0x18d   :  { %444 = vsyncpa [#allocation4], 1 }
 0x18e   :  { %446 = vsyncpa [#allocation4 + $0x1], 1 }

</bundles_post_ra>
